<compile_context>
chip_gen: v6e
topology: v6e:2x2x1
jax: 0.10.0
libtpu: 0.0.40
codegen_flags: <defaults>
</compile_context>

<pallas_src>
import jax
import jax.numpy as jnp
from jax import lax
from jax.experimental import pallas as pl
from jax.experimental.pallas import tpu as pltpu

IN_DIM = 70          # input features per branch
HID_DIM = 700        # hidden width of the four Linear(70,700) layers
EPS = 1e-6           # torch.nn.CosineSimilarity eps

# Fused, bias-folded Gram table layout (see _pair_tables):
_GA_COLS = IN_DIM + 2            # [ Wa Wa^T | 2 Wa ba | Wa bb ]
_DOT_OFF = 128                   # cross-Gram chunk starts on a lane-vreg boundary
_GB_COLS = _DOT_OFF + IN_DIM     # [ Wb Wb^T | 2 Wb bb | Wb ba | 0-pad | Wb Wa^T ]


def _discriminator_kernel(x1_ref, x2_ref, y1_ref, y2_ref,
                          gxa_ref, gxb_ref, gya_ref, gyb_ref,
                          s_ref,            # SMEM (10,) f32 scalars
                          out_ref):         # (tile_b, 1)
    eps2 = jnp.float32(EPS * EPS)
    F = IN_DIM

    def cosine(a_ref, b_ref, ga_ref, gb_ref, s_aa, s_bb, s_ab):
        a = a_ref[...].astype(jnp.float32)                    # (T, 70)
        b = b_ref[...].astype(jnp.float32)                    # (T, 70)
        ra = jnp.dot(a, ga_ref[...], preferred_element_type=jnp.float32)  # (T, 72)
        rb = jnp.dot(b, gb_ref[...], preferred_element_type=jnp.float32)  # (T, 198)

        na2 = (jnp.sum(ra[:, :F] * a, axis=-1, keepdims=True)
               + ra[:, F:F + 1] + s_aa)                       # ||h_a||^2
        nb2 = (jnp.sum(rb[:, :F] * b, axis=-1, keepdims=True)
               + rb[:, F:F + 1] + s_bb)                       # ||h_b||^2
        dot = (jnp.sum(rb[:, _DOT_OFF:_DOT_OFF + F] * a, axis=-1, keepdims=True)
               + ra[:, F + 1:F + 2] + rb[:, F + 1:F + 2] + s_ab)

        # torch.nn.CosineSimilarity: dot / (max(||h_a||, eps) * max(||h_b||, eps))
        denom2 = jnp.maximum(na2, eps2) * jnp.maximum(nb2, eps2)
        return dot * lax.rsqrt(denom2)

    cx = cosine(x1_ref, x2_ref, gxa_ref, gxb_ref, s_ref[4], s_ref[5], s_ref[6])
    cy = cosine(y1_ref, y2_ref, gya_ref, gyb_ref, s_ref[7], s_ref[8], s_ref[9])

    # dense_1 / dense_2 : Linear(1, 1) scalar affine (scalars live in SMEM)
    zx = cx * s_ref[0] + s_ref[1]
    zy = cy * s_ref[2] + s_ref[3]
    out = jax.nn.sigmoid(jax.nn.sigmoid(zx) + jax.nn.sigmoid(zy))
    out_ref[...] = out.astype(out_ref.dtype)


def _round_up(x, m):
    return ((x + m - 1) // m) * m


def _pair_tables(wa, ba, wb, bb):
    """Exact bias-folded Gram tables for one cosine pair (built from weights only)."""
    wa = wa.astype(jnp.float32)
    wb = wb.astype(jnp.float32)
    ba = ba.reshape(-1).astype(jnp.float32)
    bb = bb.reshape(-1).astype(jnp.float32)

    g_aa = wa @ wa.T                      # (70, 70)
    g_ab = wa @ wb.T
    g_bb = wb @ wb.T
    v_aa = wa @ ba                        # (70,)
    v_ab = wa @ bb
    v_bb = wb @ bb
    v_ba = wb @ ba

    ga = jnp.concatenate(
        [g_aa, (2.0 * v_aa)[:, None], v_ab[:, None]], axis=1)            # (70, 72)
    pad = jnp.zeros((IN_DIM, _DOT_OFF - (IN_DIM + 2)), jnp.float32)      # lane-align
    gb = jnp.concatenate(
        [g_bb, (2.0 * v_bb)[:, None], v_ba[:, None], pad, g_ab.T], axis=1)  # (70, 198)
    scal = jnp.stack([ba @ ba, bb @ bb, ba @ bb])     # [s_aa, s_bb, s_ab]
    return ga, gb, scal


def discriminator_forward(x1, x2, y1, y2, params, *, tile_b=2048):
    B = x1.shape[0]
    f32 = jnp.float32

    # ---- wrapper precompute touches only the (70, 700) weights, never the inputs ----
    gxa, gxb, sx = _pair_tables(params["w11"], params["b11"], params["w12"], params["b12"])
    gya, gyb, sy = _pair_tables(params["w21"], params["b21"], params["w22"], params["b22"])
    scalars = jnp.concatenate([
        jnp.stack([params["dw1"][0, 0], params["db1"][0, 0],
                   params["dw2"][0, 0], params["db2"][0, 0]]).astype(f32),
        sx, sy])                                                          # (10,) -> SMEM

    # ---- batch tiling: raw inputs, cdiv grid, partial tail block masked by Pallas ----
    tb = max(8, min(tile_b, _round_up(B, 8)))
    if B >= 512:                      # keep >=2 parallel grid steps (v7x: feed both TCs)
        tb = min(tb, _round_up(pl.cdiv(B, 2), 8))
    grid = (pl.cdiv(B, tb),)

    data_spec = pl.BlockSpec((tb, IN_DIM), lambda i: (i, 0))
    ga_spec = pl.BlockSpec((IN_DIM, _GA_COLS), lambda i: (0, 0))   # resident across grid
    gb_spec = pl.BlockSpec((IN_DIM, _GB_COLS), lambda i: (0, 0))   # resident across grid
    smem_spec = pl.BlockSpec(memory_space=pltpu.MemorySpace.SMEM)
    out_spec = pl.BlockSpec((tb, 1), lambda i: (i, 0))

    return pl.pallas_call(
        _discriminator_kernel,
        out_shape=jax.ShapeDtypeStruct((B, 1), f32),
        grid=grid,
        in_specs=[data_spec] * 4 + [ga_spec, gb_spec, ga_spec, gb_spec] + [smem_spec],
        out_specs=out_spec,
        compiler_params=pltpu.CompilerParams(
            dimension_semantics=("parallel",),
            vmem_limit_bytes=64 * 1024 * 1024),
    )(x1, x2, y1, y2, gxa, gxb, gya, gyb, scalars)


def init_params(key):
    """Deterministic init mimicking PyTorch Linear uniform(-1/sqrt(fan_in), +)."""
    ks = jax.random.split(key, 12)

    def linear_params(kw, kb, fan_in, fan_out):
        bound = 1.0 / jnp.sqrt(fan_in)
        # weight stored already transposed: (in, out)
        w = jax.random.uniform(kw, (fan_in, fan_out), jnp.float32, -bound, bound)
        b = jax.random.uniform(kb, (1, fan_out), jnp.float32, -bound, bound)
        return w, b

    w11, b11 = linear_params(ks[0], ks[1], IN_DIM, HID_DIM)
    w12, b12 = linear_params(ks[2], ks[3], IN_DIM, HID_DIM)
    w21, b21 = linear_params(ks[4], ks[5], IN_DIM, HID_DIM)
    w22, b22 = linear_params(ks[6], ks[7], IN_DIM, HID_DIM)
    dw1, db1 = linear_params(ks[8], ks[9], 1, 1)
    dw2, db2 = linear_params(ks[10], ks[11], 1, 1)
    return dict(
        w11=w11, b11=b11, w12=w12, b12=b12,
        w21=w21, b21=b21, w22=w22, b22=b22,
        dw1=dw1, db1=db1, dw2=dw2, db2=db2,
    )


def reference_forward(x1, x2, y1, y2, p):
    """Pure-JAX reference (direct formulation, PyTorch cosine eps semantics)."""
    def lin(x, w, b):
        return x @ w + b

    def cos(a, b):
        d = jnp.sum(a * b, -1, keepdims=True)
        na = jnp.maximum(jnp.linalg.norm(a, axis=-1, keepdims=True), EPS)
        nb = jnp.maximum(jnp.linalg.norm(b, axis=-1, keepdims=True), EPS)
        return d / (na * nb)

    cx = cos(lin(x1, p["w11"], p["b11"]), lin(x2, p["w12"], p["b12"]))
    cy = cos(lin(y1, p["w21"], p["b21"]), lin(y2, p["w22"], p["b22"]))
    zx = cx * p["dw1"][0, 0] + p["db1"][0, 0]
    zy = cy * p["dw2"][0, 0] + p["db2"][0, 0]
    return jax.nn.sigmoid(jax.nn.sigmoid(zx) + jax.nn.sigmoid(zy))


if __name__ == "__main__":
    key = jax.random.PRNGKey(0)
    k_in, k_par = jax.random.split(key)
    params = init_params(k_par)

    fwd = jax.jit(discriminator_forward, static_argnames=("tile_b",))

    def make_inputs(k, B):
        ks = jax.random.split(k, 4)
        return tuple(jax.random.normal(kk, (B, IN_DIM), jnp.float32) for kk in ks)

    # Case 1: small batch, single tile.
    B1 = 8
    x1, x2, y1, y2 = make_inputs(k_in, B1)
    out1 = jax.block_until_ready(fwd(x1, x2, y1, y2, params))
    ref1 = reference_forward(x1, x2, y1, y2, params)
    assert out1.shape == (B1, 1)
    assert jnp.allclose(out1, ref1, atol=2e-5, rtol=2e-5), (out1, ref1)

    # Case 2: batch not a tile multiple -> multi-tile grid with a masked tail block.
    B2 = 37
    a1, a2, b1, b2 = make_inputs(jax.random.fold_in(k_in, 1), B2)
    out2 = jax.block_until_ready(fwd(a1, a2, b1, b2, params, tile_b=16))
    ref2 = reference_forward(a1, a2, b1, b2, params)
    assert out2.shape == (B2, 1)
    assert jnp.allclose(out2, ref2, atol=2e-5, rtol=2e-5), (out2, ref2)

    # Case 3: default tile path with the >=2-step split (exercises resident Grams,
    # the parallel grid axis and the masked tail at a larger tile).
    B3 = 600
    c1, c2, d1, d2 = make_inputs(jax.random.fold_in(k_in, 2), B3)
    out3 = jax.block_until_ready(fwd(c1, c2, d1, d2, params))
    ref3 = reference_forward(c1, c2, d1, d2, params)
    assert out3.shape == (B3, 1)
    assert jnp.allclose(out3, ref3, atol=2e-5, rtol=2e-5), (out3, ref3)

    print("KERNEL_OK")
</pallas_src>

<mosaic_0001>
module attributes {stable_mosaic.version = 11 : i64} {
  func.func @_discriminator_kernel(%arg0: i32, %arg1: memref<8x70xf32, #tpu.memory_space<vmem>>, %arg2: memref<8x70xf32, #tpu.memory_space<vmem>>, %arg3: memref<8x70xf32, #tpu.memory_space<vmem>>, %arg4: memref<8x70xf32, #tpu.memory_space<vmem>>, %arg5: memref<70x72xf32, #tpu.memory_space<vmem>>, %arg6: memref<70x198xf32, #tpu.memory_space<vmem>>, %arg7: memref<70x72xf32, #tpu.memory_space<vmem>>, %arg8: memref<70x198xf32, #tpu.memory_space<vmem>>, %arg9: memref<10xf32, #tpu.memory_space<smem>>, %arg10: memref<8x1xf32, #tpu.memory_space<vmem>>) attributes {dimension_semantics = [#tpu.dimension_semantics<parallel>], iteration_bounds = array<i64: 1>, scalar_prefetch = 0 : i64, scratch_operands = 0 : i64, tpu.core_type = #tpu.core_type<tc>, window_params = [{transform_indices = @transform_0, window_bounds = array<i64: 8, 70>}, {transform_indices = @transform_1, window_bounds = array<i64: 8, 70>}, {transform_indices = @transform_2, window_bounds = array<i64: 8, 70>}, {transform_indices = @transform_3, window_bounds = array<i64: 8, 70>}, {pipeline_mode = #tpu.pipeline_mode<synchronous>, transform_indices = @transform_4, window_bounds = array<i64: 70, 72>}, {pipeline_mode = #tpu.pipeline_mode<synchronous>, transform_indices = @transform_5, window_bounds = array<i64: 70, 198>}, {pipeline_mode = #tpu.pipeline_mode<synchronous>, transform_indices = @transform_6, window_bounds = array<i64: 70, 72>}, {pipeline_mode = #tpu.pipeline_mode<synchronous>, transform_indices = @transform_7, window_bounds = array<i64: 70, 198>}, {transform_indices = @transform_8, window_bounds = array<i64: 10>}, {transform_indices = @transform_9, window_bounds = array<i64: 8, 1>}]} {
    %c4 = arith.constant 4 : index
    %0 = memref.load %arg9[%c4] : memref<10xf32, #tpu.memory_space<smem>>
    %c5 = arith.constant 5 : index
    %1 = memref.load %arg9[%c5] : memref<10xf32, #tpu.memory_space<smem>>
    %c6 = arith.constant 6 : index
    %2 = memref.load %arg9[%c6] : memref<10xf32, #tpu.memory_space<smem>>
    %c0 = arith.constant 0 : index
    %c0_0 = arith.constant 0 : index
    %3 = vector.load %arg1[%c0, %c0_0] : memref<8x70xf32, #tpu.memory_space<vmem>>, vector<8x70xf32>
    %c0_1 = arith.constant 0 : index
    %c0_2 = arith.constant 0 : index
    %4 = vector.load %arg2[%c0_1, %c0_2] : memref<8x70xf32, #tpu.memory_space<vmem>>, vector<8x70xf32>
    %c0_3 = arith.constant 0 : index
    %c0_4 = arith.constant 0 : index
    %5 = vector.load %arg5[%c0_3, %c0_4] : memref<70x72xf32, #tpu.memory_space<vmem>>, vector<70x72xf32>
    %cst = arith.constant dense<0.000000e+00> : vector<8x72xf32>
    %6 = tpu.matmul %3, %5, %cst {dimension_numbers = #tpu.dot_dimension_numbers<[1], [0], [0], [1], [0, 0, 1, 1], [], []>} : vector<8x70xf32>, vector<70x72xf32>, vector<8x72xf32> -> vector<8x72xf32>
    %c0_5 = arith.constant 0 : index
    %c0_6 = arith.constant 0 : index
    %7 = vector.load %arg6[%c0_5, %c0_6] : memref<70x198xf32, #tpu.memory_space<vmem>>, vector<70x198xf32>
    %cst_7 = arith.constant dense<0.000000e+00> : vector<8x198xf32>
    %8 = tpu.matmul %4, %7, %cst_7 {dimension_numbers = #tpu.dot_dimension_numbers<[1], [0], [0], [1], [0, 0, 1, 1], [], []>} : vector<8x70xf32>, vector<70x198xf32>, vector<8x198xf32> -> vector<8x198xf32>
    %9 = vector.extract_strided_slice %6 {offsets = [0, 0], sizes = [8, 70], strides = [1, 1]} : vector<8x72xf32> to vector<8x70xf32>
    %10 = arith.mulf %9, %3 : vector<8x70xf32>
    %cst_8 = arith.constant dense<0.000000e+00> : vector<8xf32>
    %11 = vector.multi_reduction <add>, %10, %cst_8 [1] : vector<8x70xf32> to vector<8xf32>
    %12 = vector.shape_cast %11 : vector<8xf32> to vector<8x1xf32>
    %13 = vector.extract_strided_slice %6 {offsets = [0, 70], sizes = [8, 1], strides = [1, 1]} : vector<8x72xf32> to vector<8x1xf32>
    %14 = arith.addf %12, %13 : vector<8x1xf32>
    %15 = vector.broadcast %0 : f32 to vector<8x1xf32>
    %16 = arith.addf %14, %15 : vector<8x1xf32>
    %17 = vector.extract_strided_slice %8 {offsets = [0, 0], sizes = [8, 70], strides = [1, 1]} : vector<8x198xf32> to vector<8x70xf32>
    %18 = arith.mulf %17, %4 : vector<8x70xf32>
    %cst_9 = arith.constant dense<0.000000e+00> : vector<8xf32>
    %19 = vector.multi_reduction <add>, %18, %cst_9 [1] : vector<8x70xf32> to vector<8xf32>
    %20 = vector.shape_cast %19 : vector<8xf32> to vector<8x1xf32>
    %21 = vector.extract_strided_slice %8 {offsets = [0, 70], sizes = [8, 1], strides = [1, 1]} : vector<8x198xf32> to vector<8x1xf32>
    %22 = arith.addf %20, %21 : vector<8x1xf32>
    %23 = vector.broadcast %1 : f32 to vector<8x1xf32>
    %24 = arith.addf %22, %23 : vector<8x1xf32>
    %25 = vector.extract_strided_slice %8 {offsets = [0, 128], sizes = [8, 70], strides = [1, 1]} : vector<8x198xf32> to vector<8x70xf32>
    %26 = arith.mulf %25, %3 : vector<8x70xf32>
    %cst_10 = arith.constant dense<0.000000e+00> : vector<8xf32>
    %27 = vector.multi_reduction <add>, %26, %cst_10 [1] : vector<8x70xf32> to vector<8xf32>
    %28 = vector.shape_cast %27 : vector<8xf32> to vector<8x1xf32>
    %29 = vector.extract_strided_slice %6 {offsets = [0, 71], sizes = [8, 1], strides = [1, 1]} : vector<8x72xf32> to vector<8x1xf32>
    %30 = arith.addf %28, %29 : vector<8x1xf32>
    %31 = vector.extract_strided_slice %8 {offsets = [0, 71], sizes = [8, 1], strides = [1, 1]} : vector<8x198xf32> to vector<8x1xf32>
    %32 = arith.addf %30, %31 : vector<8x1xf32>
    %33 = vector.broadcast %2 : f32 to vector<8x1xf32>
    %34 = arith.addf %32, %33 : vector<8x1xf32>
    %cst_11 = arith.constant 9.99999996E-13 : f32
    %35 = vector.broadcast %cst_11 : f32 to vector<8x1xf32>
    %36 = arith.maximumf %16, %35 : vector<8x1xf32>
    %cst_12 = arith.constant 9.99999996E-13 : f32
    %37 = vector.broadcast %cst_12 : f32 to vector<8x1xf32>
    %38 = arith.maximumf %24, %37 : vector<8x1xf32>
    %39 = arith.mulf %36, %38 : vector<8x1xf32>
    %40 = math.rsqrt %39 : vector<8x1xf32>
    %41 = arith.mulf %34, %40 : vector<8x1xf32>
    %c7 = arith.constant 7 : index
    %42 = memref.load %arg9[%c7] : memref<10xf32, #tpu.memory_space<smem>>
    %c8 = arith.constant 8 : index
    %43 = memref.load %arg9[%c8] : memref<10xf32, #tpu.memory_space<smem>>
    %c9 = arith.constant 9 : index
    %44 = memref.load %arg9[%c9] : memref<10xf32, #tpu.memory_space<smem>>
    %c0_13 = arith.constant 0 : index
    %c0_14 = arith.constant 0 : index
    %45 = vector.load %arg3[%c0_13, %c0_14] : memref<8x70xf32, #tpu.memory_space<vmem>>, vector<8x70xf32>
    %c0_15 = arith.constant 0 : index
    %c0_16 = arith.constant 0 : index
    %46 = vector.load %arg4[%c0_15, %c0_16] : memref<8x70xf32, #tpu.memory_space<vmem>>, vector<8x70xf32>
    %c0_17 = arith.constant 0 : index
    %c0_18 = arith.constant 0 : index
    %47 = vector.load %arg7[%c0_17, %c0_18] : memref<70x72xf32, #tpu.memory_space<vmem>>, vector<70x72xf32>
    %cst_19 = arith.constant dense<0.000000e+00> : vector<8x72xf32>
    %48 = tpu.matmul %45, %47, %cst_19 {dimension_numbers = #tpu.dot_dimension_numbers<[1], [0], [0], [1], [0, 0, 1, 1], [], []>} : vector<8x70xf32>, vector<70x72xf32>, vector<8x72xf32> -> vector<8x72xf32>
    %c0_20 = arith.constant 0 : index
    %c0_21 = arith.constant 0 : index
    %49 = vector.load %arg8[%c0_20, %c0_21] : memref<70x198xf32, #tpu.memory_space<vmem>>, vector<70x198xf32>
    %cst_22 = arith.constant dense<0.000000e+00> : vector<8x198xf32>
    %50 = tpu.matmul %46, %49, %cst_22 {dimension_numbers = #tpu.dot_dimension_numbers<[1], [0], [0], [1], [0, 0, 1, 1], [], []>} : vector<8x70xf32>, vector<70x198xf32>, vector<8x198xf32> -> vector<8x198xf32>
    %51 = vector.extract_strided_slice %48 {offsets = [0, 0], sizes = [8, 70], strides = [1, 1]} : vector<8x72xf32> to vector<8x70xf32>
    %52 = arith.mulf %51, %45 : vector<8x70xf32>
    %cst_23 = arith.constant dense<0.000000e+00> : vector<8xf32>
    %53 = vector.multi_reduction <add>, %52, %cst_23 [1] : vector<8x70xf32> to vector<8xf32>
    %54 = vector.shape_cast %53 : vector<8xf32> to vector<8x1xf32>
    %55 = vector.extract_strided_slice %48 {offsets = [0, 70], sizes = [8, 1], strides = [1, 1]} : vector<8x72xf32> to vector<8x1xf32>
    %56 = arith.addf %54, %55 : vector<8x1xf32>
    %57 = vector.broadcast %42 : f32 to vector<8x1xf32>
    %58 = arith.addf %56, %57 : vector<8x1xf32>
    %59 = vector.extract_strided_slice %50 {offsets = [0, 0], sizes = [8, 70], strides = [1, 1]} : vector<8x198xf32> to vector<8x70xf32>
    %60 = arith.mulf %59, %46 : vector<8x70xf32>
    %cst_24 = arith.constant dense<0.000000e+00> : vector<8xf32>
    %61 = vector.multi_reduction <add>, %60, %cst_24 [1] : vector<8x70xf32> to vector<8xf32>
    %62 = vector.shape_cast %61 : vector<8xf32> to vector<8x1xf32>
    %63 = vector.extract_strided_slice %50 {offsets = [0, 70], sizes = [8, 1], strides = [1, 1]} : vector<8x198xf32> to vector<8x1xf32>
    %64 = arith.addf %62, %63 : vector<8x1xf32>
    %65 = vector.broadcast %43 : f32 to vector<8x1xf32>
    %66 = arith.addf %64, %65 : vector<8x1xf32>
    %67 = vector.extract_strided_slice %50 {offsets = [0, 128], sizes = [8, 70], strides = [1, 1]} : vector<8x198xf32> to vector<8x70xf32>
    %68 = arith.mulf %67, %45 : vector<8x70xf32>
    %cst_25 = arith.constant dense<0.000000e+00> : vector<8xf32>
    %69 = vector.multi_reduction <add>, %68, %cst_25 [1] : vector<8x70xf32> to vector<8xf32>
    %70 = vector.shape_cast %69 : vector<8xf32> to vector<8x1xf32>
    %71 = vector.extract_strided_slice %48 {offsets = [0, 71], sizes = [8, 1], strides = [1, 1]} : vector<8x72xf32> to vector<8x1xf32>
    %72 = arith.addf %70, %71 : vector<8x1xf32>
    %73 = vector.extract_strided_slice %50 {offsets = [0, 71], sizes = [8, 1], strides = [1, 1]} : vector<8x198xf32> to vector<8x1xf32>
    %74 = arith.addf %72, %73 : vector<8x1xf32>
    %75 = vector.broadcast %44 : f32 to vector<8x1xf32>
    %76 = arith.addf %74, %75 : vector<8x1xf32>
    %cst_26 = arith.constant 9.99999996E-13 : f32
    %77 = vector.broadcast %cst_26 : f32 to vector<8x1xf32>
    %78 = arith.maximumf %58, %77 : vector<8x1xf32>
    %cst_27 = arith.constant 9.99999996E-13 : f32
    %79 = vector.broadcast %cst_27 : f32 to vector<8x1xf32>
    %80 = arith.maximumf %66, %79 : vector<8x1xf32>
    %81 = arith.mulf %78, %80 : vector<8x1xf32>
    %82 = math.rsqrt %81 : vector<8x1xf32>
    %83 = arith.mulf %76, %82 : vector<8x1xf32>
    %c0_28 = arith.constant 0 : index
    %84 = memref.load %arg9[%c0_28] : memref<10xf32, #tpu.memory_space<smem>>
    %85 = vector.broadcast %84 : f32 to vector<8x1xf32>
    %86 = arith.mulf %41, %85 : vector<8x1xf32>
    %c1 = arith.constant 1 : index
    %87 = memref.load %arg9[%c1] : memref<10xf32, #tpu.memory_space<smem>>
    %88 = vector.broadcast %87 : f32 to vector<8x1xf32>
    %89 = arith.addf %86, %88 : vector<8x1xf32>
    %c2 = arith.constant 2 : index
    %90 = memref.load %arg9[%c2] : memref<10xf32, #tpu.memory_space<smem>>
    %91 = vector.broadcast %90 : f32 to vector<8x1xf32>
    %92 = arith.mulf %83, %91 : vector<8x1xf32>
    %c3 = arith.constant 3 : index
    %93 = memref.load %arg9[%c3] : memref<10xf32, #tpu.memory_space<smem>>
    %94 = vector.broadcast %93 : f32 to vector<8x1xf32>
    %95 = arith.addf %92, %94 : vector<8x1xf32>
    %96 = arith.negf %89 : vector<8x1xf32>
    %97 = math.exp %96 : vector<8x1xf32>
    %cst_29 = arith.constant 1.000000e+00 : f32
    %98 = vector.broadcast %cst_29 : f32 to vector<8x1xf32>
    %99 = arith.addf %98, %97 : vector<8x1xf32>
    %100 = arith.divf %98, %99 : vector<8x1xf32>
    %101 = arith.negf %95 : vector<8x1xf32>
    %102 = math.exp %101 : vector<8x1xf32>
    %cst_30 = arith.constant 1.000000e+00 : f32
    %103 = vector.broadcast %cst_30 : f32 to vector<8x1xf32>
    %104 = arith.addf %103, %102 : vector<8x1xf32>
    %105 = arith.divf %103, %104 : vector<8x1xf32>
    %106 = arith.addf %100, %105 : vector<8x1xf32>
    %107 = arith.negf %106 : vector<8x1xf32>
    %108 = math.exp %107 : vector<8x1xf32>
    %cst_31 = arith.constant 1.000000e+00 : f32
    %109 = vector.broadcast %cst_31 : f32 to vector<8x1xf32>
    %110 = arith.addf %109, %108 : vector<8x1xf32>
    %111 = arith.divf %109, %110 : vector<8x1xf32>
    %c0_32 = arith.constant 0 : index
    %c0_33 = arith.constant 0 : index
    %112 = vector.load %arg10[%c0_32, %c0_33] : memref<8x1xf32, #tpu.memory_space<vmem>>, vector<8x1xf32>
    tpu.vector_store %arg10[%c0_32, %c0_33], %111 {strides = array<i32>} : memref<8x1xf32, #tpu.memory_space<vmem>>, vector<8x1xf32>,
    return
  }
  func.func @transform_0(%arg0: i32) -> (i32, i32) {
    %c0_i32 = arith.constant 0 : i32
    %c0_i32_0 = arith.constant 0 : i32
    return %arg0, %c0_i32 : i32, i32
  }
  func.func @transform_1(%arg0: i32) -> (i32, i32) {
    %c0_i32 = arith.constant 0 : i32
    %c0_i32_0 = arith.constant 0 : i32
    return %arg0, %c0_i32 : i32, i32
  }
  func.func @transform_2(%arg0: i32) -> (i32, i32) {
    %c0_i32 = arith.constant 0 : i32
    %c0_i32_0 = arith.constant 0 : i32
    return %arg0, %c0_i32 : i32, i32
  }
  func.func @transform_3(%arg0: i32) -> (i32, i32) {
    %c0_i32 = arith.constant 0 : i32
    %c0_i32_0 = arith.constant 0 : i32
    return %arg0, %c0_i32 : i32, i32
  }
  func.func @transform_4(%arg0: i32) -> (i32, i32) {
    %c0_i32 = arith.constant 0 : i32
    %c0_i32_0 = arith.constant 0 : i32
    %c0_i32_1 = arith.constant 0 : i32
    return %c0_i32, %c0_i32_0 : i32, i32
  }
  func.func @transform_5(%arg0: i32) -> (i32, i32) {
    %c0_i32 = arith.constant 0 : i32
    %c0_i32_0 = arith.constant 0 : i32
    %c0_i32_1 = arith.constant 0 : i32
    return %c0_i32, %c0_i32_0 : i32, i32
  }
  func.func @transform_6(%arg0: i32) -> (i32, i32) {
    %c0_i32 = arith.constant 0 : i32
    %c0_i32_0 = arith.constant 0 : i32
    %c0_i32_1 = arith.constant 0 : i32
    return %c0_i32, %c0_i32_0 : i32, i32
  }
  func.func @transform_7(%arg0: i32) -> (i32, i32) {
    %c0_i32 = arith.constant 0 : i32
    %c0_i32_0 = arith.constant 0 : i32
    %c0_i32_1 = arith.constant 0 : i32
    return %c0_i32, %c0_i32_0 : i32, i32
  }
  func.func @transform_8(%arg0: i32) -> i32 {
    %c0_i32 = arith.constant 0 : i32
    %c0_i32_0 = arith.constant 0 : i32
    return %c0_i32 : i32
  }
  func.func @transform_9(%arg0: i32) -> (i32, i32) {
    %c0_i32 = arith.constant 0 : i32
    %c0_i32_0 = arith.constant 0 : i32
    return %arg0, %c0_i32 : i32, i32
  }
}

</mosaic_0001>

<bundles_post_ra>
// kernel: discriminator_forward.1
= control target key start
LH: loop header
LB: loop body
LE: loop exit
PB: predicated region body
PF: predicated region fallthrough
CT: control target
= control target key end

     0   :  { %14 = vsyncpa [#allocation3], 0  ;;  %s930_s0 = inlined_call_operand.vmem [shape: f32[8,70], index: 0, kind: input, shape index: {}]   ;;  %s931_s1 = inlined_call_operand.vmem [shape: f32[8,70], index: 1, kind: input, shape index: {}]   ;;  %s932_s2 = inlined_call_operand.vmem [shape: f32[8,70], index: 2, kind: input, shape index: {}]   ;;  %s933_s3 = inlined_call_operand.vmem [shape: f32[8,70], index: 3, kind: input, shape index: {}]   ;;  %s934_s4 = inlined_call_operand.vmem [shape: f32[70,72], index: 4, kind: input, shape index: {}]   ;;  %s935_s5 = inlined_call_operand.vmem [shape: f32[70,198], index: 5, kind: input, shape index: {}]   ;;  %s936_s6 = inlined_call_operand.vmem [shape: f32[70,72], index: 6, kind: input, shape index: {}]   ;;  %s937_s7 = inlined_call_operand.vmem [shape: f32[70,198], index: 7, kind: input, shape index: {}]   ;;  %s938_s8 = inlined_call_operand.vmem [shape: f32[10], index: 8, kind: input, shape index: {}]   ;;  %s939_s9 = inlined_call_operand.vmem [shape: f32[8,1], index: 9, kind: output, shape index: {}]  }
   0x1   :  { %s37_s11 = sshll.u32 %s938_s8, 4  ;;  %s38_s11 = int_to_ptr.vmem [resolvable:$true] %s37_s11 }
   0x2   :  { %s632_s12 = scalar_lea.vmem %s38_s11, 16  ;;  %p637_p1 = scmp.lt.s32.totalorder %s38_s11, %s38_s11 }
   0x3   :  { %p633_p0 = scmp.ne.s32.totalorder %s38_s11, %s632_s12  ;;  %p638_p2 = scmp.lt.s32.totalorder %s632_s12, %s632_s12 }
   0x5   :  { %p639_p3 = por %p638_p2, %p637_p1 }
   0x7   :  { %p640_p4 = pnand %p639_p3, %p633_p0 }
   0x9   :  { %643 = shalt.err (!%p640_p4)
}
   0xa   :  { %s646_s13 = smov [#allocation2]  }
   0xb   :  { %40 = dma.vmem_to_smem %s38_s11, 16, %s646_s13, [#allocation3]  }
   0xc   :  { %644 = dma.done.wait [#allocation3], 16  }
   0xd   :  { %645 = vsyncadd [#allocation3], 4294967280 }
   0xe   :  { %44 = sfence }
   0xf   :  { %v58_v0 = vld [vmem:[%s934_s4 + $0x40] sm:$0x3f]  ;;  %vm63_vm0 = vcmask 1045504   ;;  %v154_v1 = vld [vmem:[%s935_s5 + $0x88] sm:$0x3f]  ;;  %v647_v2 = vmov 0.0  }
  0x10   :  { %569 = vmatprep.subr.mxu0 %v647_v2  ;;  %532 = vmatprep.subr.msk.mxu1 %vm63_vm0, %v154_v1  ;;  %v57_v3 = vld [vmem:[%s934_s4 + $0x38] sm:$0xff]  ;;  %v153_v4 = vld [vmem:[%s935_s5 + $0x80] sm:$0x3f]  ;;  %v151_v6 = vld [vmem:[%s935_s5 + $0x70] sm:$0xff]  ;;  %vm648_vm1 = vmmov 0   ;;  %vm59_vm2 = vcmask 572416  }
  0x11   :  { %v152_v5 = vld [vmem:[%s935_s5 + $0x78] sm:$0xff]  ;;  %570 = vmatpush3.msk.msra.mxu0 %vm63_vm0, %v58_v0  ;;  %533 = vmatpush1.msk.msra.mxu1 %vm63_vm0, %v153_v4  ;;  %v150_v7 = vld [vmem:[%s935_s5 + $0x68] sm:$0xff]  ;;  %v56_v8 = vld [vmem:[%s934_s4 + $0x30] sm:$0xff]  ;;  %s536_s29 = sld [smem:[#allocation2 + $0x8]]  ;;  %s649_s30 = smov 1   ;;  %vm520_vm3 = vcmask 7168  }
  0x12   :  { %571 = vmatprep.subr.mxu0 %v647_v2  ;;  %180 = vmatprep.subr.mxu1 %v152_v5  ;;  %v149_v9 = vld [vmem:[%s935_s5 + $0x60] sm:$0xff]  ;;  %v148_v10 = vld [vmem:[%s935_s5 + $0x58] sm:$0xff]  ;;  %v55_v11 = vld [vmem:[%s934_s4 + $0x28] sm:$0xff]  ;;  %s529_s10 = sld [smem:[#allocation2 + $0x6]]  ;;  %s650_s15 = smov 57  }
  0x13   :  { %572 = vmatpush3.msra.mxu0 %v57_v3  ;;  %181 = vmatpush1.msra.mxu1 %v151_v6  ;;  %v147_v12 = vld [vmem:[%s935_s5 + $0x50] sm:$0xff]  ;;  %v146_v13 = vld [vmem:[%s935_s5 + $0x48] sm:$0xff]  ;;  %v54_v14 = vld [vmem:[%s934_s4 + $0x20] sm:$0xff]  ;;  %s485_s11 = sld [smem:[#allocation2]] }
  0x14   :  { %573 = vmatprep.subr.mxu0 %v647_v2  ;;  %182 = vmatprep.subr.mxu1 %v150_v7  ;;  %v145_v15 = vld [vmem:[%s935_s5 + $0x40] sm:$0xff]  ;;  %v144_v16 = vld [vmem:[%s935_s5 + $0x38] sm:$0xff]  ;;  %v143_v18 = vld [vmem:[%s935_s5 + $0x30] sm:$0xff]  ;;  %s543_s12 = sld [smem:[#allocation2 + $0x1]] }
  0x15   :  { %574 = vmatpush3.msra.mxu0 %v56_v8  ;;  %183 = vmatpush1.msra.mxu1 %v149_v9  ;;  %v53_v17 = vld [vmem:[%s934_s4 + $0x18] sm:$0xff]  ;;  %v142_v19 = vld [vmem:[%s935_s5 + $0x28] sm:$0xff]  ;;  %v52_v20 = vld [vmem:[%s934_s4 + $0x10] sm:$0xff]  ;;  %s544_s13 = sld [smem:[#allocation2 + $0x2]] }
  0x16   :  { %575 = vmatprep.subr.mxu0 %v647_v2  ;;  %184 = vmatprep.subr.mxu1 %v148_v10  ;;  %v141_v21 = vld [vmem:[%s935_s5 + $0x20] sm:$0xff]  ;;  %v140_v22 = vld [vmem:[%s935_s5 + $0x18] sm:$0xff]  ;;  %v51_v23 = vld [vmem:[%s934_s4 + $0x8] sm:$0xff]  ;;  %s545_s14 = sld [smem:[#allocation2 + $0x3]] }
  0x17   :  { %576 = vmatpush3.msra.mxu0 %v55_v11  ;;  %185 = vmatpush1.msra.mxu1 %v147_v12  ;;  %v139_v24 = vld [vmem:[%s935_s5 + $0x10] sm:$0xff]  ;;  %v50_v25 = vld [vmem:[%s934_s4] sm:$0xff]  ;;  %v138_v26 = vld [vmem:[%s935_s5 + $0x8] sm:$0xff] }
  0x18   :  { %577 = vmatprep.subr.mxu0 %v647_v2  ;;  %186 = vmatprep.subr.mxu1 %v146_v13  ;;  %v798_v27 = vld [vmem:[%s930_s0] sm:$0xff]  ;;  %v373_v30 = vld [vmem:[%s937_s7 + $0x88] sm:$0x3f]  ;;  %v278_v32 = vld [vmem:[%s936_s6 + $0x38] sm:$0xff] }
  0x19   :  { %578 = vmatpush3.msra.mxu0 %v54_v14  ;;  %187 = vmatpush1.msra.mxu1 %v145_v15  ;;  %v137_v28 = vld [vmem:[%s935_s5] sm:$0xff]  ;;  %v371_v34 = vld [vmem:[%s937_s7 + $0x78] sm:$0xff]  ;;  %v277_v35 = vld [vmem:[%s936_s6 + $0x30] sm:$0xff]  ;;  %s535_s5 = sld [smem:[#allocation2 + $0x7]] }
  0x1a   :  { %579 = vmatprep.subr.mxu0 %v647_v2  ;;  %188 = vmatprep.subr.mxu1 %v144_v16  ;;  %v279_v29 = vld [vmem:[%s936_s6 + $0x40] sm:$0x3f]  ;;  %v370_v36 = vld [vmem:[%s937_s7 + $0x70] sm:$0xff]  ;;  %v369_v37 = vld [vmem:[%s937_s7 + $0x68] sm:$0xff] }
  0x1b   :  { %580 = vmatpush3.msra.mxu0 %v53_v17  ;;  %189 = vmatpush1.msra.mxu1 %v143_v18  ;;  %v816_v31 = vld [vmem:[%s931_s1] sm:$0xff]  ;;  %v276_v38 = vld [vmem:[%s936_s6 + $0x28] sm:$0xff]  ;;  %v367_v40 = vld [vmem:[%s937_s7 + $0x58] sm:$0xff]  ;;  %s537_s1 = sld [smem:[#allocation2 + $0x9]] }
  0x1c   :  { %581 = vmatprep.subr.mxu0 %v647_v2  ;;  %190 = vmatprep.subr.mxu1 %v142_v19  ;;  %v372_v33 = vld [vmem:[%s937_s7 + $0x80] sm:$0x3f]  ;;  %v366_v42 = vld [vmem:[%s937_s7 + $0x50] sm:$0xff]  ;;  %v365_v43 = vld [vmem:[%s937_s7 + $0x48] sm:$0xff] }
  0x1d   :  { %582 = vmatpush3.msra.mxu0 %v52_v20  ;;  %191 = vmatpush1.msra.mxu1 %v141_v21  ;;  %v368_v39 = vld [vmem:[%s937_s7 + $0x60] sm:$0xff]  ;;  %v274_v44 = vld [vmem:[%s936_s6 + $0x18] sm:$0xff]  ;;  %v273_v47 = vld [vmem:[%s936_s6 + $0x10] sm:$0xff] }
  0x1e   :  { %583 = vmatprep.subr.mxu0 %v647_v2  ;;  %192 = vmatprep.subr.mxu1 %v140_v22  ;;  %v275_v41 = vld [vmem:[%s936_s6 + $0x20] sm:$0xff]  ;;  %v363_v46 = vld [vmem:[%s937_s7 + $0x38] sm:$0xff]  ;;  %v362_v48 = vld [vmem:[%s937_s7 + $0x30] sm:$0xff] }
  0x1f   :  { %584 = vmatpush3.msra.mxu0 %v51_v23  ;;  %587 = vmatprep.mubr.msk.f32.mxu0 %vm648_vm1, %v647_v2  ;;  %v364_v45 = vld [vmem:[%s937_s7 + $0x40] sm:$0xff]  ;;  %v361_v49 = vld [vmem:[%s937_s7 + $0x28] sm:$0xff]  ;;  %v359_v52 = vld [vmem:[%s937_s7 + $0x18] sm:$0xff] }
  0x20   :  { %585 = vmatprep.subr.mxu0 %v647_v2  ;;  %193 = vmatpush1.msra.mxu1 %v139_v24  ;;  %v272_v50 = vld [vmem:[%s936_s6 + $0x8] sm:$0xff]  ;;  %v360_v51 = vld [vmem:[%s937_s7 + $0x20] sm:$0xff]  ;;  %v358_v54 = vld [vmem:[%s937_s7 + $0x10] sm:$0xff] }
  0x21   :  { %586 = vmatpush3.msra.mxu0 %v50_v25  ;;  %194 = vmatprep.subr.mxu1 %v138_v26  ;;  %v271_v53 = vld [vmem:[%s936_s6] sm:$0xff]  ;;  %v357_v56 = vld [vmem:[%s937_s7 + $0x8] sm:$0xff] }
  0x22   :  { %588 = vmatmul.mubr.msk.f32.vlgmr.msra.gmra.mxu0 %vm59_vm2, %v798_v27  ;;  %590 = vmatprep.subr.mxu0 %v647_v2  ;;  %v269_v55 = vld [vmem:[%s932_s2] sm:$0xff] }
  0x23   :  { %195 = vmatpush1.msra.mxu1 %v137_v28  ;;  %591 = vmatpush3.msk.msra.mxu0 %vm63_vm0, %v279_v29  ;;  %v356_v57 = vld [vmem:[%s937_s7] sm:$0xff]  ;;  %s528_s7 = sld [smem:[#allocation2 + $0x5]]  ;;  %v459_v28 = vstv %s535_s5  ;;  %v466_v29 = vstv %s536_s29 }
  0x24   :  { %228 = vmatprep.mubr.f32.mxu1 %v647_v2  ;;  %592 = vmatprep.subr.mxu0 %v647_v2  ;;  %v270_v58 = vld [vmem:[%s933_s3] sm:$0xff]  ;;  %s527_s3 = sld [smem:[#allocation2 + $0x4]] }
  0x25   :  { %540 = vmatprep.subr.msk.mxu1 %vm63_vm0, %v373_v30  ;;  %534 = vmatmul.mubr.msk.f32.vlgmr.msra.gmra.mxu1 %vm59_vm2, %v816_v31 }
  0x26   :  { %593 = vmatpush3.msra.mxu0 %v278_v32  ;;  %541 = vmatpush1.msk.msra.mxu1 %vm63_vm0, %v372_v33 }
  0x27   :  { %594 = vmatprep.subr.mxu0 %v647_v2  ;;  %399 = vmatprep.subr.mxu1 %v371_v34 }
  0x28   :  { %595 = vmatpush3.msra.mxu0 %v277_v35  ;;  %400 = vmatpush1.msra.mxu1 %v370_v36 }
  0x29   :  { %596 = vmatprep.subr.mxu0 %v647_v2  ;;  %401 = vmatprep.subr.mxu1 %v369_v37  ;;  %v247_v19 = vstv %s528_s7 }
  0x2a   :  { %597 = vmatpush3.msra.mxu0 %v276_v38  ;;  %402 = vmatpush1.msra.mxu1 %v368_v39  ;;  %v240_v17 = vstv %s527_s3 }
  0x2b   :  { %598 = vmatprep.subr.mxu0 %v647_v2  ;;  %403 = vmatprep.subr.mxu1 %v367_v40 }
  0x2c   :  { %599 = vmatpush3.msra.mxu0 %v275_v41  ;;  %404 = vmatpush1.msra.mxu1 %v366_v42  ;;  %v255_v42 = vstv %s529_s10 }
  0x2d   :  { %600 = vmatprep.subr.mxu0 %v647_v2  ;;  %405 = vmatprep.subr.mxu1 %v365_v43 }
  0x2e   :  { %601 = vmatpush3.msra.mxu0 %v274_v44  ;;  %406 = vmatpush1.msra.mxu1 %v364_v45 }
  0x2f   :  { %602 = vmatprep.subr.mxu0 %v647_v2  ;;  %407 = vmatprep.subr.mxu1 %v363_v46 }
  0x30   :  { %603 = vmatpush3.msra.mxu0 %v273_v47  ;;  %408 = vmatpush1.msra.mxu1 %v362_v48  ;;  %v486_v47 = vstv %s485_s11 }
  0x31   :  { %604 = vmatprep.subr.mxu0 %v647_v2  ;;  %409 = vmatprep.subr.mxu1 %v361_v49 }
  0x32   :  { %605 = vmatpush3.msra.mxu0 %v272_v50  ;;  %410 = vmatpush1.msra.mxu1 %v360_v51  ;;  %v489_v50 = vstv %s543_s12 }
  0x33   :  { %606 = vmatprep.subr.mxu0 %v647_v2  ;;  %411 = vmatprep.subr.mxu1 %v359_v52 }
  0x34   :  { %607 = vmatpush3.msra.mxu0 %v271_v53  ;;  %608 = vmatprep.mubr.msk.f32.mxu0 %vm648_vm1, %v647_v2  ;;  %v474_v53 = vstv %s537_s1 }
  0x35   :  { %412 = vmatpush1.msra.mxu1 %v358_v54  ;;  %609 = vmatmul.mubr.msk.f32.vlgmr.msra.gmra.mxu0 %vm59_vm2, %v269_v55 }
  0x36   :  { %413 = vmatprep.subr.mxu1 %v357_v56  ;;  %447 = vmatprep.mubr.f32.mxu1 %v647_v2  ;;  %v492_v56 = vstv %s544_s13 }
  0x37   :  { %414 = vmatpush1.msra.mxu1 %v356_v57 }
  0x38   :  { %542 = vmatmul.mubr.msk.f32.vlgmr.msra.gmra.mxu1 %vm59_vm2, %v270_v58 }
  0xe2   :  { %v133_v59 = vpop.f32.mrf.mxu0 }
  0xe3   :  { %v235_v60 = vmul.f32 %v133_v59, %v798_v27 }
  0xe4   :  { %v589_v61 = vpop.f32.mrf.mxu0 }
  0xe5   :  { %v230_v62 = vpop.f32.mrf.mxu1  ;;  %v236_v63 = vsel %vm59_vm2, %v235_v60, 0.0 }
  0xe6   :  { %237 = vadd.xlane.f32.xlu0 %v236_v63  ;;  %v242_v0 = vmul.f32 %v230_v62, %v816_v31 }
  0xe7   :  { %v232_v1 = vpop.f32.mrf.mxu1 }
  0xe8   :  { %v243_v3 = vsel %vm59_vm2, %v242_v0, 0.0  ;;  %v249_v4 = vmul.f32 %v232_v1, %v798_v27 }
  0xea   :  { %244 = vadd.xlane.f32.xlu0 %v243_v3  ;;  %v250_v2 = vsel %vm59_vm2, %v249_v4, 0.0 }
  0xee   :  { %251 = vadd.xlane.f32.xlu0 %v250_v2 }
  0xf5   :  { %v352_v5 = vpop.f32.mrf.mxu0 }
  0xf6   :  { %v454_v6 = vmul.f32 %v352_v5, %v269_v55 }
  0xf7   :  { %v610_v7 = vpop.f32.mrf.mxu0 }
  0xf8   :  { %v449_v8 = vpop.f32.mrf.mxu1  ;;  %v455_v9 = vsel %vm59_vm2, %v454_v6, 0.0 }
  0xf9   :  { %456 = vadd.xlane.f32.xlu1 %v455_v9  ;;  %v461_v10 = vmul.f32 %v449_v8, %v270_v58 }
  0xfa   :  { %v451_v11 = vpop.f32.mrf.mxu1 }
  0xfb   :  { %v462_v12 = vsel %vm59_vm2, %v461_v10, 0.0  ;;  %v468_v13 = vmul.f32 %v451_v11, %v269_v55 }
  0xfd   :  { %463 = vadd.xlane.f32.xlu1 %v462_v12  ;;  %v469_v14 = vsel %vm59_vm2, %v468_v13, 0.0 }
 0x101   :  { %470 = vadd.xlane.f32.xlu1 %v469_v14 }
 0x16f   :  { %v238_v15 = vpop.xlane.xlu0 %237 }
 0x170   :  { %v239_v16 = vadd.f32 %v238_v15, %v133_v59 }
 0x172   :  { %v241_v20 = vadd.f32 %v240_v17, %v239_v16 }
 0x173   :  { %v245_v18 = vpop.xlane.xlu0 %244 }
 0x174   :  { %v246_v21 = vadd.f32 %v245_v18, %v230_v62  ;;  %v257_v23 = vmax.f32 %v241_v20, 1e-12 }
 0x176   :  { %v248_v22 = vadd.f32 %v247_v19, %v246_v21 }
 0x177   :  { %v252_v39 = vpop.xlane.xlu0 %251 }
 0x178   :  { %v258_v24 = vmax.f32 %v248_v22, 1e-12  ;;  %v253_v40 = vadd.f32 %v252_v39, %v133_v59  ;;  %v495_v59 = vstv %s545_s14 }
 0x17a   :  { %v259_v25 = vmul.f32 %v258_v24, %v257_v23  ;;  %v254_v41 = vadd.f32 %v253_v40, %v230_v62 }
 0x17c   :  { %616 = vrsqrt.f32 %v259_v25  ;;  %v256_v44 = vadd.f32 %v255_v42, %v254_v41 }
 0x182   :  { %v457_v26 = vpop.xlane.xlu1 %456 }
 0x183   :  { %v458_v27 = vadd.f32 %v457_v26, %v352_v5 }
 0x185   :  { %v460_v31 = vadd.f32 %v459_v28, %v458_v27 }
 0x186   :  { %v464_v30 = vpop.xlane.xlu1 %463 }
 0x187   :  { %v465_v32 = vadd.f32 %v464_v30, %v449_v8  ;;  %v476_v35 = vmax.f32 %v460_v31, 1e-12 }
 0x189   :  { %v617_v33 = vpop.eup %616  ;;  %v467_v34 = vadd.f32 %v466_v29, %v465_v32 }
 0x18a   :  { %262 = vrot.lane.b32.xlu0 %v617_v33, %s649_s30  ;;  %v471_v45 = vpop.xlane.xlu1 %470 }
 0x18b   :  { %v477_v36 = vmax.f32 %v467_v34, 1e-12  ;;  %v472_v48 = vadd.f32 %v471_v45, %v352_v5 }
 0x18d   :  { %v478_v37 = vmul.f32 %v477_v36, %v476_v35  ;;  %v473_v51 = vadd.f32 %v472_v48, %v449_v8 }
 0x18f   :  { %618 = vrsqrt.f32 %v478_v37  ;;  %v475_v54 = vadd.f32 %v474_v53, %v473_v51 }
 0x19c   :  { %v619_v38 = vpop.eup %618 }
 0x19d   :  { %481 = vrot.lane.b32.xlu1 %v619_v38, %s649_s30 }
 0x1fc   :  { %v263_v43 = vpop.permute.xlu0 %262 }
 0x1fd   :  { %v265_v46 = vmul.f32 %v263_v43, %v256_v44 }
 0x1ff   :  { %v487_v49 = vmul.f32 %v486_v47, %v265_v46 }
 0x201   :  { %v490_v52 = vadd.f32 %v489_v50, %v487_v49 }
 0x203   :  { %v546_v55 = vmul.f32 -1.442695, %v490_v52 }
 0x205   :  { %620 = vpow2.f32 %v546_v55 }
 0x20f   :  { %v482_v57 = vpop.permute.xlu1 %481 }
 0x210   :  { %v484_v58 = vmul.f32 %v482_v57, %v475_v54 }
 0x212   :  { %v493_v60 = vmul.f32 %v492_v56, %v484_v58  ;;  %v621_v63 = vpop.eup %620 }
 0x213   :  { %v500_v0 = vadd.f32 1.0, %v621_v63 }
 0x214   :  { %v496_v61 = vadd.f32 %v495_v59, %v493_v60 }
 0x216   :  { %v547_v62 = vmul.f32 -1.442695, %v496_v61 }
 0x218   :  { %622 = vpow2.f32 %v547_v62 }
 0x219   :  { %624 = vrcp.f32 %v500_v0 }
 0x225   :  { %v623_v1 = vpop.eup %622 }
 0x226   :  { %v506_v3 = vadd.f32 1.0, %v623_v1  ;;  %v625_v4 = vpop.eup %624 }
 0x228   :  { %626 = vrcp.f32 %v506_v3 }
 0x235   :  { %v627_v2 = vpop.eup %626 }
 0x236   :  { %v509_v5 = vadd.f32 %v627_v2, %v625_v4 }
 0x238   :  { %v548_v6 = vmul.f32 -1.442695, %v509_v5 }
 0x23a   :  { %628 = vpow2.f32 %v548_v6 }
 0x247   :  { %v629_v7 = vpop.eup %628 }
 0x248   :  { %v513_v8 = vadd.f32 1.0, %v629_v7 }
 0x24a   :  { %630 = vrcp.f32 %v513_v8 }
 0x257   :  { %v631_v9 = vpop.eup %630 }
 0x258   :  { %517 = vrot.lane.b32.xlu1 %v631_v9, %s650_s15 }
 0x2ca   :  { %v518_v10 = vpop.permute.xlu1 %517 }
 0x2cb   :  { %521 = vst.msk [vmem:[%s939_s9] sm:$0xff] %vm520_vm3, %v518_v10 }
 0x2cc   :  { %526 = vsyncpa [#allocation3], 1 }

</bundles_post_ra>
